<compile_context>
chip_gen: v5e
topology: v5e:2x2
jax: 0.10.0
libtpu: 0.0.40
codegen_flags: <defaults>
</compile_context>

<pallas_src>
import math
from functools import partial

import jax
import jax.numpy as jnp
from jax.experimental import pallas as pl
from jax.experimental.pallas import tpu as pltpu

BN_EPS = 1e-5
LANE = 128


def mlp_bn_post_kernel(x_ref, w_in_ref, w_hid_ref, b_hid_ref,
                       w_out_ref, b_out_ref, o_ref):
    """MLPBNPost forward (num_layers=1) on a single full-array VMEM block."""
    inv_b = jnp.float32(1.0 / x_ref.shape[0])

    def bn_normalize(h):
        # One-pass batch stats: sum and sum-of-squares issue back-to-back on
        # the XLU while the VPU computes h*h; mu/var derived from them.
        s1 = jnp.sum(h, axis=0, keepdims=True)
        s2 = jnp.sum(h * h, axis=0, keepdims=True)
        mu = s1 * inv_b
        var = s2 * inv_b - mu * mu
        return (h - mu) * jax.lax.rsqrt(var + BN_EPS)

    x = x_ref[...].astype(jnp.bfloat16)

    # h = bn(relu(fc_in(x)))   (BN affine folded forward into the next layer)
    h = jnp.dot(x, w_in_ref[...], preferred_element_type=jnp.float32)
    h = jnp.maximum(h, 0.0)
    h = bn_normalize(h)

    # h = bn(relu(layers[0](h)))   (layers[0] weight/bias carry folded gamma/beta)
    h = jnp.dot(h.astype(jnp.bfloat16), w_hid_ref[...],
                preferred_element_type=jnp.float32) + b_hid_ref[...]
    h = jnp.maximum(h, 0.0)
    h = bn_normalize(h)

    # out = fc_out(h)   (lane-padded output: unmasked, lane-dense store)
    o_ref[...] = (jnp.dot(h.astype(jnp.bfloat16), w_out_ref[...],
                          preferred_element_type=jnp.float32) + b_out_ref[...])


def prepare_params(w_in, w_hid, w_out, b_out, gamma, beta):
    """One-time parameter transform — call once, outside the hot path.

    - transpose PyTorch (out, in) weights to (in, out)
    - fold the shared BatchNorm1d affine into the following linear layer:
        bn(h) @ W = (norm(h)*gamma + beta) @ W
                  = norm(h) @ (gamma[:, None] * W) + beta @ W
      (gamma/beta are constants, so this is a valid one-time transform)
    - cast matmul weights to bf16 (MXU-rate), keep biases f32
    - zero-pad output features up to a multiple of 128 lanes
    """
    hidden = w_in.shape[0]
    out_dim = w_out.shape[0]
    out_pad = ((out_dim + LANE - 1) // LANE) * LANE

    w_in_t = w_in.T                                   # (in, hidden)
    w_hid_f = gamma[:, None] * w_hid.T                # (hidden, hidden)
    b_hid_f = beta @ w_hid.T                          # (hidden,)
    w_out_f = gamma[:, None] * w_out.T                # (hidden, out_dim)
    b_out_f = beta @ w_out.T + b_out                  # (out_dim,)

    w_out_p = jnp.zeros((hidden, out_pad), jnp.float32).at[:, :out_dim].set(w_out_f)
    b_out_p = jnp.zeros((1, out_pad), jnp.float32).at[:, :out_dim].set(b_out_f)

    params = dict(
        w_in=w_in_t.astype(jnp.bfloat16),
        w_hid=w_hid_f.astype(jnp.bfloat16),
        b_hid=b_hid_f.reshape(1, hidden).astype(jnp.float32),
        w_out=w_out_p.astype(jnp.bfloat16),
        b_out=b_out_p,
    )
    return params, out_dim


@partial(jax.jit, static_argnames=("out_dim",))
def mlp_bn_post_forward(x, w_in, w_hid, b_hid, w_out, b_out, *, out_dim):
    """Jitted forward: a single pallas_call plus a slice of the lane padding."""
    B = x.shape[0]
    out_pad = w_out.shape[1]
    vmem = pl.BlockSpec(memory_space=pltpu.MemorySpace.VMEM)
    out_padded = pl.pallas_call(
        mlp_bn_post_kernel,
        out_shape=jax.ShapeDtypeStruct((B, out_pad), jnp.float32),
        in_specs=[vmem] * 6,
        out_specs=vmem,
    )(x, w_in, w_hid, b_hid, w_out, b_out)
    return out_padded[:, :out_dim]
    # TODO(synk): for large batch sizes this single-block design should become a
    # batch-tiled grid with two-phase BN (partial sum/sumsq scratch, resident
    # weights) and a "parallel" batch axis so v7x's 2 TensorCores are both used.


def reference_forward(x, w_in, w_hid, w_out, b_out, gamma, beta):
    """Pure-JAX f32 reference matching the PyTorch module's forward."""
    def bn(h):
        mu = jnp.mean(h, axis=0, keepdims=True)
        var = jnp.mean((h - mu) ** 2, axis=0, keepdims=True)
        return (h - mu) / jnp.sqrt(var + BN_EPS) * gamma + beta

    h = jnp.maximum(x @ w_in.T, 0.0)
    h = bn(h)
    h = jnp.maximum(h @ w_hid.T, 0.0)
    h = bn(h)
    return h @ w_out.T + b_out


def kaiming_uniform(key, out_features, in_features):
    # nn.init.kaiming_uniform_(w, nonlinearity='relu'):
    # bound = gain * sqrt(3 / fan_in), gain = sqrt(2)  ->  sqrt(6 / fan_in)
    bound = math.sqrt(6.0 / in_features)
    return jax.random.uniform(key, (out_features, in_features),
                              dtype=jnp.float32, minval=-bound, maxval=bound)


if __name__ == "__main__":
    # Small shapes consistent with MLPBNPost.forward (num_layers=1).
    batch = 16
    input_dim = 4
    hidden_size = 32
    output_dim = 4

    root = jax.random.PRNGKey(0)
    k_x, k_in, k_hid, k_out_w, k_out_b = jax.random.split(root, 5)

    x = jax.random.normal(k_x, (batch, input_dim), dtype=jnp.float32)

    w_in = kaiming_uniform(k_in, hidden_size, input_dim)       # fc_in.weight
    w_hid = kaiming_uniform(k_hid, hidden_size, hidden_size)   # layers[0].weight
    w_out = kaiming_uniform(k_out_w, output_dim, hidden_size)  # fc_out.weight
    b_bound = 1.0 / math.sqrt(hidden_size)                     # default Linear bias init
    b_out = jax.random.uniform(k_out_b, (output_dim,), dtype=jnp.float32,
                               minval=-b_bound, maxval=b_bound)
    # The module uses a single shared nn.BatchNorm1d for both BN applications,
    # so one gamma/beta pair is the faithful translation.
    gamma = jnp.ones((hidden_size,), dtype=jnp.float32)         # bn.weight default
    beta = jnp.zeros((hidden_size,), dtype=jnp.float32)         # bn.bias default
    # TODO(synk): training-mode BatchNorm1d also updates running_mean/running_var;
    # those buffer side-effects are not reproduced (forward activations only).

    params, out_dim = prepare_params(w_in, w_hid, w_out, b_out, gamma, beta)

    out = mlp_bn_post_forward(
        x, params["w_in"], params["w_hid"], params["b_hid"],
        params["w_out"], params["b_out"], out_dim=out_dim)
    jax.block_until_ready(out)

    assert out.shape == (batch, output_dim)
    ref = reference_forward(x, w_in, w_hid, w_out, b_out, gamma, beta)
    assert jnp.allclose(out, ref, atol=5e-2, rtol=5e-2), \
        f"max abs err {jnp.max(jnp.abs(out - ref))}"
    print("KERNEL_OK")
</pallas_src>

<mosaic_0001>
module attributes {stable_mosaic.version = 11 : i64} {
  func.func @mlp_bn_post_kernel(%arg0: memref<16x4xf32, #tpu.memory_space<vmem>>, %arg1: memref<4x32xbf16, #tpu.memory_space<vmem>>, %arg2: memref<32x32xbf16, #tpu.memory_space<vmem>>, %arg3: memref<1x32xf32, #tpu.memory_space<vmem>>, %arg4: memref<32x128xbf16, #tpu.memory_space<vmem>>, %arg5: memref<1x128xf32, #tpu.memory_space<vmem>>, %arg6: memref<16x128xf32, #tpu.memory_space<vmem>>) attributes {dimension_semantics = [], scalar_prefetch = 0 : i64, scratch_operands = 0 : i64, tpu.core_type = #tpu.core_type<tc>} {
    %c0 = arith.constant 0 : index
    %c0_0 = arith.constant 0 : index
    %0 = vector.load %arg0[%c0, %c0_0] : memref<16x4xf32, #tpu.memory_space<vmem>>, vector<16x4xf32>
    %1 = arith.truncf %0 : vector<16x4xf32> to vector<16x4xbf16>
    %c0_1 = arith.constant 0 : index
    %c0_2 = arith.constant 0 : index
    %2 = vector.load %arg1[%c0_1, %c0_2] : memref<4x32xbf16, #tpu.memory_space<vmem>>, vector<4x32xbf16>
    %cst = arith.constant dense<0.000000e+00> : vector<16x32xf32>
    %3 = tpu.matmul %1, %2, %cst {dimension_numbers = #tpu.dot_dimension_numbers<[1], [0], [0], [1], [0, 0, 1, 1], [], []>} : vector<16x4xbf16>, vector<4x32xbf16>, vector<16x32xf32> -> vector<16x32xf32>
    %cst_3 = arith.constant 0.000000e+00 : f32
    %4 = vector.broadcast %cst_3 : f32 to vector<16x32xf32>
    %5 = arith.maximumf %3, %4 : vector<16x32xf32>
    %cst_4 = arith.constant dense<0.000000e+00> : vector<32xf32>
    %6 = vector.multi_reduction <add>, %5, %cst_4 [0] : vector<16x32xf32> to vector<32xf32>
    %7 = vector.shape_cast %6 : vector<32xf32> to vector<1x32xf32>
    %8 = arith.mulf %5, %5 : vector<16x32xf32>
    %cst_5 = arith.constant dense<0.000000e+00> : vector<32xf32>
    %9 = vector.multi_reduction <add>, %8, %cst_5 [0] : vector<16x32xf32> to vector<32xf32>
    %10 = vector.shape_cast %9 : vector<32xf32> to vector<1x32xf32>
    %cst_6 = arith.constant 6.250000e-02 : f32
    %11 = vector.broadcast %cst_6 : f32 to vector<1x32xf32>
    %12 = arith.mulf %7, %11 : vector<1x32xf32>
    %cst_7 = arith.constant 6.250000e-02 : f32
    %13 = vector.broadcast %cst_7 : f32 to vector<1x32xf32>
    %14 = arith.mulf %10, %13 : vector<1x32xf32>
    %15 = arith.mulf %12, %12 : vector<1x32xf32>
    %16 = arith.subf %14, %15 : vector<1x32xf32>
    %17 = vector.broadcast %12 : vector<1x32xf32> to vector<16x32xf32>
    %18 = arith.subf %5, %17 : vector<16x32xf32>
    %cst_8 = arith.constant 9.99999974E-6 : f32
    %19 = vector.broadcast %cst_8 : f32 to vector<1x32xf32>
    %20 = arith.addf %16, %19 : vector<1x32xf32>
    %21 = math.rsqrt %20 : vector<1x32xf32>
    %22 = vector.broadcast %21 : vector<1x32xf32> to vector<16x32xf32>
    %23 = arith.mulf %18, %22 : vector<16x32xf32>
    %24 = arith.truncf %23 : vector<16x32xf32> to vector<16x32xbf16>
    %c0_9 = arith.constant 0 : index
    %c0_10 = arith.constant 0 : index
    %25 = vector.load %arg2[%c0_9, %c0_10] : memref<32x32xbf16, #tpu.memory_space<vmem>>, vector<32x32xbf16>
    %cst_11 = arith.constant dense<0.000000e+00> : vector<16x32xf32>
    %26 = tpu.matmul %24, %25, %cst_11 {dimension_numbers = #tpu.dot_dimension_numbers<[1], [0], [0], [1], [0, 0, 1, 1], [], []>} : vector<16x32xbf16>, vector<32x32xbf16>, vector<16x32xf32> -> vector<16x32xf32>
    %c0_12 = arith.constant 0 : index
    %c0_13 = arith.constant 0 : index
    %27 = vector.load %arg3[%c0_12, %c0_13] : memref<1x32xf32, #tpu.memory_space<vmem>>, vector<1x32xf32>
    %28 = vector.broadcast %27 : vector<1x32xf32> to vector<16x32xf32>
    %29 = arith.addf %26, %28 : vector<16x32xf32>
    %cst_14 = arith.constant 0.000000e+00 : f32
    %30 = vector.broadcast %cst_14 : f32 to vector<16x32xf32>
    %31 = arith.maximumf %29, %30 : vector<16x32xf32>
    %cst_15 = arith.constant dense<0.000000e+00> : vector<32xf32>
    %32 = vector.multi_reduction <add>, %31, %cst_15 [0] : vector<16x32xf32> to vector<32xf32>
    %33 = vector.shape_cast %32 : vector<32xf32> to vector<1x32xf32>
    %34 = arith.mulf %31, %31 : vector<16x32xf32>
    %cst_16 = arith.constant dense<0.000000e+00> : vector<32xf32>
    %35 = vector.multi_reduction <add>, %34, %cst_16 [0] : vector<16x32xf32> to vector<32xf32>
    %36 = vector.shape_cast %35 : vector<32xf32> to vector<1x32xf32>
    %cst_17 = arith.constant 6.250000e-02 : f32
    %37 = vector.broadcast %cst_17 : f32 to vector<1x32xf32>
    %38 = arith.mulf %33, %37 : vector<1x32xf32>
    %cst_18 = arith.constant 6.250000e-02 : f32
    %39 = vector.broadcast %cst_18 : f32 to vector<1x32xf32>
    %40 = arith.mulf %36, %39 : vector<1x32xf32>
    %41 = arith.mulf %38, %38 : vector<1x32xf32>
    %42 = arith.subf %40, %41 : vector<1x32xf32>
    %43 = vector.broadcast %38 : vector<1x32xf32> to vector<16x32xf32>
    %44 = arith.subf %31, %43 : vector<16x32xf32>
    %cst_19 = arith.constant 9.99999974E-6 : f32
    %45 = vector.broadcast %cst_19 : f32 to vector<1x32xf32>
    %46 = arith.addf %42, %45 : vector<1x32xf32>
    %47 = math.rsqrt %46 : vector<1x32xf32>
    %48 = vector.broadcast %47 : vector<1x32xf32> to vector<16x32xf32>
    %49 = arith.mulf %44, %48 : vector<16x32xf32>
    %50 = arith.truncf %49 : vector<16x32xf32> to vector<16x32xbf16>
    %c0_20 = arith.constant 0 : index
    %c0_21 = arith.constant 0 : index
    %51 = vector.load %arg4[%c0_20, %c0_21] : memref<32x128xbf16, #tpu.memory_space<vmem>>, vector<32x128xbf16>
    %cst_22 = arith.constant dense<0.000000e+00> : vector<16x128xf32>
    %52 = tpu.matmul %50, %51, %cst_22 {dimension_numbers = #tpu.dot_dimension_numbers<[1], [0], [0], [1], [0, 0, 1, 1], [], []>} : vector<16x32xbf16>, vector<32x128xbf16>, vector<16x128xf32> -> vector<16x128xf32>
    %c0_23 = arith.constant 0 : index
    %c0_24 = arith.constant 0 : index
    %53 = vector.load %arg5[%c0_23, %c0_24] : memref<1x128xf32, #tpu.memory_space<vmem>>, vector<1x128xf32>
    %54 = vector.broadcast %53 : vector<1x128xf32> to vector<16x128xf32>
    %55 = arith.addf %52, %54 : vector<16x128xf32>
    %c0_25 = arith.constant 0 : index
    %c0_26 = arith.constant 0 : index
    %56 = vector.load %arg6[%c0_25, %c0_26] : memref<16x128xf32, #tpu.memory_space<vmem>>, vector<16x128xf32>
    tpu.vector_store %arg6[%c0_25, %c0_26], %55 {strides = array<i32>} : memref<16x128xf32, #tpu.memory_space<vmem>>, vector<16x128xf32>,
    return
  }
}

</mosaic_0001>

<bundles_post_ra>
// kernel: mlp_bn_post_forward.1
= control target key start
LH: loop header
LB: loop body
LE: loop exit
PB: predicated region body
PF: predicated region fallthrough
CT: control target
= control target key end

     0   :  { %11 = vsyncpa [#allocation3], 0  ;;  %s290_s24 = smov [#allocation2]   ;;  %s291_s26 = smov 64   ;;  %s368_s0 = inlined_call_operand.vmem [shape: f32[16,4], index: 0, kind: input, shape index: {}]   ;;  %s369_s1 = inlined_call_operand.vmem [shape: bf16[4,32], index: 1, kind: input, shape index: {}]   ;;  %s370_s2 = inlined_call_operand.vmem [shape: bf16[32,32], index: 2, kind: input, shape index: {}]   ;;  %s371_s3 = inlined_call_operand.vmem [shape: f32[1,32], index: 3, kind: input, shape index: {}]   ;;  %s372_s4 = inlined_call_operand.hbm [shape: bf16[32,128], index: 4, kind: input, shape index: {}]   ;;  %s373_s5 = inlined_call_operand.vmem [shape: f32[1,128], index: 5, kind: input, shape index: {}]   ;;  %s374_s6 = inlined_call_operand.vmem [shape: f32[16,128], index: 6, kind: output, shape index: {}]  }
   0x1   :  { %s24_s23 = sshll.u32 %s372_s4, 4  ;;  %s26_s25 = sshll.u32 %s290_s24, 4  ;;  %s25_s23 = int_to_ptr.hbm [resolvable:$true] %s24_s23  ;;  %s27_s25 = int_to_ptr.vmem [resolvable:$true] %s26_s25 }
   0x2   :  { %s292_s27 = smov 4  }
   0x3   :  { %32 = dma.hbm_to_vmem [thread:$0]  %s25_s23, 256, %s27_s25, [#allocation3], %s291_s26, %s291_s26, %s292_s27  }
   0x4   :  { %288 = dma.done.wait [#allocation3], 256  }
   0x5   :  { %289 = vsyncadd [#allocation3], 4294967040  ;;  %vm48_vm0 = vcmask 1041408   ;;  %v43_v0 = vld [vmem:[%s369_s1] sm:$0x3]  ;;  %v41_v2 = vld [vmem:[%s368_s0 + $0x8] sm:$0xff] }
   0x6   :  { %v40_v1 = vld [vmem:[%s368_s0] sm:$0xff]  ;;  %v50_v3 = vsel %vm48_vm0, %v43_v0, 0  ;;  %vm44_vm1 = vcmask 31744   ;;  %v252_v5 = vld [vmem:[%s370_s2 + $0x8] sm:$0xff]  ;;  %vm68_vm2 = vcmask 261120  }
   0x7   :  { %v42_v4 = vpack.c.bf16 %v41_v2, %v40_v1  ;;  %59 = vmatpush.bf16.msra.mxu0 %v50_v3  ;;  %138 = vmatpush.bf16.msra.mxu1 %v252_v5  ;;  %v251_v6 = vld [vmem:[%s370_s2] sm:$0xff]  ;;  %v254_v48 = vld [vmem:[#allocation2 + $0x8] sm:$0xff] }
   0x8   :  { %v258_v49 = vld [vmem:[%s371_s3] ss:$0 sm:$0xff]  ;;  %217 = vmatpush.bf16.msra.mxu2 %v254_v48 }
   0x9   :  { %v253_v51 = vld [vmem:[#allocation2] sm:$0xff] }
   0xa   :  { %232 = vmatmul.msk.bf16.vlgmr.msra.gmra.mxu0 %vm44_vm1, %v42_v4 }
   0xb   :  { %139 = vmatpush.bf16.msra.mxu1 %v251_v6 }
   0xc   :  { %218 = vmatpush.bf16.msra.mxu2 %v253_v51 }
  0x87   :  { %v61_v7 = vpop.f32.mrf.mxu0 }
  0x88   :  { %v66_v8 = vmax.f32 %v61_v7, 0.0 }
  0x8a   :  { %v78_v10 = vmul.f32 %v66_v8, %v66_v8  ;;  %v69_v12 = vsel %vm68_vm2, %v66_v8, 0.0 }
  0x8c   :  { %v80_v16 = vsel %vm68_vm2, %v78_v10, 0.0 }
  0x8f   :  { %v63_v9 = vpop.f32.mrf.mxu0 }
  0x90   :  { %v67_v11 = vmax.f32 %v63_v9, 0.0 }
  0x92   :  { %v70_v13 = vsel %vm68_vm2, %v67_v11, 0.0  ;;  %v79_v14 = vmul.f32 %v67_v11, %v67_v11 }
  0x93   :  { %v71_v15 = vadd.f32 %v70_v13, %v69_v12 }
  0x94   :  { %v81_v17 = vsel %vm68_vm2, %v79_v14, 0.0 }
  0x95   :  { %v72_v18 = vrot.slane %v71_v15, 4  ;;  %v82_v19 = vadd.f32 %v81_v17, %v80_v16 }
  0x97   :  { %v73_v20 = vadd.f32 %v72_v18, %v71_v15  ;;  %v83_v21 = vrot.slane %v82_v19, 4 }
  0x99   :  { %v74_v22 = vrot.slane %v73_v20, 2  ;;  %v84_v23 = vadd.f32 %v83_v21, %v82_v19 }
  0x9b   :  { %v75_v24 = vadd.f32 %v74_v22, %v73_v20  ;;  %v85_v25 = vrot.slane %v84_v23, 2 }
  0x9d   :  { %v76_v26 = vrot.slane %v75_v24, 1  ;;  %v86_v27 = vadd.f32 %v85_v25, %v84_v23 }
  0x9f   :  { %v77_v28 = vadd.f32 %v76_v26, %v75_v24  ;;  %v87_v29 = vrot.slane %v86_v27, 1 }
  0xa1   :  { %v88_v30 = vadd.f32 %v87_v29, %v86_v27  ;;  %v89_v31 = vmul.f32 0.0625, %v77_v28 }
  0xa3   :  { %v90_v32 = vmul.f32 0.0625, %v88_v30  ;;  %v91_v33 = vmul.f32 %v89_v31, %v89_v31  ;;  %v94_v42 = vsub.f32 %v67_v11, %v89_v31  ;;  %v93_v43 = vsub.f32 %v66_v8, %v89_v31  ;;  %v259_v30 = vld [vmem:[%s373_s5] ss:$0 sm:$0xff] }
  0xa5   :  { %v92_v34 = vsub.f32 %v90_v32, %v91_v33 }
  0xa7   :  { %v95_v35 = vadd.f32 1e-05, %v92_v34 }
  0xa9   :  { %260 = vrsqrt.f32 %v95_v35  ;;  %vm102_vm4 = vweird.f32 %v95_v35 }
  0xaf   :  { %v261_v36 = vpop.eup %260 }
  0xb0   :  { %v97_v37 = vmul.f32 %v261_v36, %v95_v35  ;;  %vm103_vm3 = vweird.f32 %v261_v36 }
  0xb1   :  { %vm104_vm5 = vmor %vm102_vm4, %vm103_vm3 }
  0xb2   :  { %v98_v38 = vmul.f32 %v261_v36, %v97_v37 }
  0xb4   :  { %v99_v39 = vmul.f32 0.5, %v98_v38 }
  0xb6   :  { %v100_v40 = vsub.f32 1.5, %v99_v39 }
  0xb8   :  { %v101_v41 = vmul.f32 %v261_v36, %v100_v40 }
  0xba   :  { %v105_v44 = vsel %vm104_vm5, %v261_v36, %v101_v41 }
  0xbb   :  { %v106_v45 = vmul.f32 %v105_v44, %v93_v43  ;;  %v107_v46 = vmul.f32 %v105_v44, %v94_v42 }
  0xbd   :  { %v108_v47 = vpack.c.bf16 %v107_v46, %v106_v45 }
  0xbf   :  { %241 = vmatmul.msk.bf16.vlgmr.msra.gmra.mxu1 %vm68_vm2, %v108_v47 }
 0x13c   :  { %v141_v50 = vpop.f32.mrf.mxu1 }
 0x13d   :  { %v142_v52 = vadd.f32 %v258_v49, %v141_v50 }
 0x13f   :  { %v146_v53 = vmax.f32 %v142_v52, 0.0 }
 0x141   :  { %v157_v56 = vmul.f32 %v146_v53, %v146_v53  ;;  %v148_v58 = vsel %vm68_vm2, %v146_v53, 0.0 }
 0x143   :  { %v159_v62 = vsel %vm68_vm2, %v157_v56, 0.0 }
 0x144   :  { %v143_v54 = vpop.f32.mrf.mxu1 }
 0x145   :  { %v144_v55 = vadd.f32 %v258_v49, %v143_v54 }
 0x147   :  { %v147_v57 = vmax.f32 %v144_v55, 0.0 }
 0x149   :  { %v149_v59 = vsel %vm68_vm2, %v147_v57, 0.0  ;;  %v158_v60 = vmul.f32 %v147_v57, %v147_v57 }
 0x14a   :  { %v150_v61 = vadd.f32 %v149_v59, %v148_v58 }
 0x14b   :  { %v160_v63 = vsel %vm68_vm2, %v158_v60, 0.0 }
 0x14c   :  { %v151_v0 = vrot.slane %v150_v61, 4  ;;  %v161_v1 = vadd.f32 %v160_v63, %v159_v62 }
 0x14e   :  { %v152_v2 = vadd.f32 %v151_v0, %v150_v61  ;;  %v162_v3 = vrot.slane %v161_v1, 4 }
 0x150   :  { %v153_v4 = vrot.slane %v152_v2, 2  ;;  %v163_v5 = vadd.f32 %v162_v3, %v161_v1 }
 0x152   :  { %v154_v6 = vadd.f32 %v153_v4, %v152_v2  ;;  %v164_v7 = vrot.slane %v163_v5, 2 }
 0x154   :  { %v155_v8 = vrot.slane %v154_v6, 1  ;;  %v165_v9 = vadd.f32 %v164_v7, %v163_v5 }
 0x156   :  { %v156_v10 = vadd.f32 %v155_v8, %v154_v6  ;;  %v166_v11 = vrot.slane %v165_v9, 1 }
 0x158   :  { %v167_v12 = vadd.f32 %v166_v11, %v165_v9  ;;  %v168_v13 = vmul.f32 0.0625, %v156_v10 }
 0x15a   :  { %v169_v14 = vmul.f32 0.0625, %v167_v12  ;;  %v170_v15 = vmul.f32 %v168_v13, %v168_v13  ;;  %v173_v24 = vsub.f32 %v147_v57, %v168_v13  ;;  %v172_v25 = vsub.f32 %v146_v53, %v168_v13 }
 0x15c   :  { %v171_v16 = vsub.f32 %v169_v14, %v170_v15 }
 0x15e   :  { %v174_v17 = vadd.f32 1e-05, %v171_v16 }
 0x160   :  { %262 = vrsqrt.f32 %v174_v17  ;;  %vm181_vm7 = vweird.f32 %v174_v17 }
 0x166   :  { %v263_v18 = vpop.eup %262 }
 0x167   :  { %v176_v19 = vmul.f32 %v263_v18, %v174_v17  ;;  %vm182_vm6 = vweird.f32 %v263_v18 }
 0x168   :  { %vm183_vm8 = vmor %vm181_vm7, %vm182_vm6 }
 0x169   :  { %v177_v20 = vmul.f32 %v263_v18, %v176_v19 }
 0x16b   :  { %v178_v21 = vmul.f32 0.5, %v177_v20 }
 0x16d   :  { %v179_v22 = vsub.f32 1.5, %v178_v21 }
 0x16f   :  { %v180_v23 = vmul.f32 %v263_v18, %v179_v22 }
 0x171   :  { %v184_v26 = vsel %vm183_vm8, %v263_v18, %v180_v23 }
 0x172   :  { %v185_v27 = vmul.f32 %v184_v26, %v172_v25  ;;  %v186_v28 = vmul.f32 %v184_v26, %v173_v24 }
 0x174   :  { %v187_v29 = vpack.c.bf16 %v186_v28, %v185_v27 }
 0x176   :  { %250 = vmatmul.msk.bf16.vlgmr.msra.gmra.mxu2 %vm68_vm2, %v187_v29 }
 0x1f9   :  { %v220_v31 = vpop.f32.mrf.mxu2 }
 0x1fa   :  { %v221_v32 = vadd.f32 %v259_v30, %v220_v31 }
 0x1fc   :  { %225 = vst [vmem:[%s374_s6] sm:$0xff] %v221_v32 }
 0x201   :  { %v222_v33 = vpop.f32.mrf.mxu2 }
 0x202   :  { %v223_v34 = vadd.f32 %v259_v30, %v222_v33 }
 0x204   :  { %226 = vst [vmem:[%s374_s6 + $0x8] sm:$0xff] %v223_v34 }
 0x205   :  { %231 = vsyncpa [#allocation3], 1 }

</bundles_post_ra>
